<compile_context>
chip_gen: v7x
topology: tpu7x:2x2x1
jax: 0.10.0
libtpu: 0.0.40
codegen_flags: <defaults>
</compile_context>

<pallas_src>
import jax
import jax.numpy as jnp
from jax import lax
from jax.experimental import pallas as pl
from jax.experimental.pallas import tpu as pltpu

EPS = 1e-8
ALPHA = 0.01


def _weighted_mine_kernel(
    x_ref,     # [TILE, DX] f32   natural-layout feature tile
    y_ref,     # [TILE, DY] f32
    ys_ref,    # [TILE, DY] f32   shuffled-y tile
    w_ref,     # [2, TILE]  f32   row 0 = w, row 1 = w_shuffled
    w1x_ref,   # [H, DX]    f32   first-layer weight (x part), transposed
    w1y_ref,   # [H, DY]    f32   first-layer weight (y part), transposed
    b1_ref,    # [H, 1]     f32
    w2_ref,    # [H, 1]     f32
    b2_ref,    # [1]        f32   SMEM scalar
    out_ref,   # [4, TILE]  f32   rows: t, t_shuf, w*t, w_shuf*t_shuf
):
    # Transposed contractions: [H, D] x [TILE, D] -> [H, TILE].  Batch lands on
    # the lane axis so all downstream math and the store are lane-dense.
    dims = (((1,), (1,)), ((), ()))
    hx = lax.dot_general(w1x_ref[...], x_ref[...], dims,
                         preferred_element_type=jnp.float32)
    hy = lax.dot_general(w1y_ref[...], y_ref[...], dims,
                         preferred_element_type=jnp.float32)
    hys = lax.dot_general(w1y_ref[...], ys_ref[...], dims,
                          preferred_element_type=jnp.float32)

    b1 = b1_ref[...]          # [H, 1]
    w2 = w2_ref[...]          # [H, 1]
    b2 = b2_ref[0]            # scalar (SMEM)

    h_j = jnp.maximum(hx + hy + b1, 0.0)     # [H, TILE]  joint pass
    h_s = jnp.maximum(hx + hys + b1, 0.0)    # [H, TILE]  shuffled pass (x reused)

    # Output "layer" (N = 1): VPU multiply + sublane reduce instead of a wasted
    # MXU pass with a single useful output column.
    t_j = jnp.sum(h_j * w2, axis=0, keepdims=True) + b2      # [1, TILE]
    t_s = jnp.sum(h_s * w2, axis=0, keepdims=True) + b2      # [1, TILE]
    wt_j = w_ref[0:1, :] * t_j
    wt_s = w_ref[1:2, :] * t_s

    # Single lane-dense packed store.
    out_ref[...] = jnp.concatenate([t_j, t_s, wt_j, wt_s], axis=0)


def _round_up(n, m):
    return ((n + m - 1) // m) * m


def weighted_mine_forward(params, x, y, w, running_mean, perm,
                          alpha=ALPHA, tile_b=1024):
    """Mirrors WeightedMine.forward.  Returns (outputs_tuple, new_running_mean)."""
    x = x.astype(jnp.float32)
    y = y.astype(jnp.float32)
    w = w.astype(jnp.float32)

    B, dx = x.shape
    dy = y.shape[1]
    H = params["w1x"].shape[1]

    y_shuf = y[perm]
    w_shuf = w[perm]

    # --- batch tiling -----------------------------------------------------------
    tile_b = max(128, (int(tile_b) // 128) * 128)     # lane tile, multiple of 128
    b128 = _round_up(B, 128)
    if b128 <= tile_b:
        # Whole batch fits in one tile.  If there is enough work, split into two
        # tiles so a v7x megacore can shard the "parallel" grid axis; otherwise
        # keep a single 128-lane tile (one grid step of fixed cost).
        tile_b = _round_up(pl.cdiv(B, 2), 128) if b128 >= 256 else b128
    n_tiles = pl.cdiv(B, tile_b)
    b_pad = n_tiles * tile_b
    pad = b_pad - B

    # Only a (conditional) zero-pad of the batch axis remains in the wrapper --
    # no concat / transpose / cast relayout passes; the kernel streams the
    # natural-layout f32 arrays directly.
    if pad:
        x_in = jnp.pad(x, ((0, pad), (0, 0)))
        y_in = jnp.pad(y, ((0, pad), (0, 0)))
        ys_in = jnp.pad(y_shuf, ((0, pad), (0, 0)))
        w_col = jnp.pad(w[:, 0], (0, pad))            # padded rows get w == 0
        ws_col = jnp.pad(w_shuf[:, 0], (0, pad))
    else:
        x_in, y_in, ys_in = x, y, y_shuf
        w_col = w[:, 0]
        ws_col = w_shuf[:, 0]
    w_rows = jnp.stack([w_col, ws_col], axis=0)        # [2, b_pad] (tiny)

    w1x_t = params["w1x"].T                            # [H, dx]
    w1y_t = params["w1y"].T                            # [H, dy]
    b1c = params["b1"].reshape(H, 1)
    w2c = params["w2"].reshape(H, 1)
    b2c = params["b2"].reshape(1)                      # SMEM scalar

    # Explicit pipelined-VMEM budget so large tiles stay portable (v5e default
    # scoped limit is 16 MiB; v7x physical VMEM is 64 MiB).
    vmem_est = (
        2 * tile_b * (dx + 2 * dy) * 4     # double-buffered x / y / y_shuf tiles
        + 2 * 2 * tile_b * 4               # double-buffered weight rows
        + 2 * 4 * tile_b * 4               # double-buffered output slab
        + 4 * H * tile_b * 4               # hidden intermediates (both passes)
        + H * (dx + dy + 8) * 4            # resident layer weights
    )
    vmem_limit = int(min(max(2 * vmem_est, 16 * 2**20), 48 * 2**20))

    slab = pl.pallas_call(
        _weighted_mine_kernel,
        out_shape=jax.ShapeDtypeStruct((4, b_pad), jnp.float32),
        grid=(n_tiles,),
        in_specs=[
            pl.BlockSpec((tile_b, dx), lambda i: (i, 0)),        # x (streamed)
            pl.BlockSpec((tile_b, dy), lambda i: (i, 0)),        # y (streamed)
            pl.BlockSpec((tile_b, dy), lambda i: (i, 0)),        # y_shuf (streamed)
            pl.BlockSpec((2, tile_b), lambda i: (0, i)),         # sample weights
            pl.BlockSpec((H, dx), lambda i: (0, 0)),             # W1x^T (VMEM-resident)
            pl.BlockSpec((H, dy), lambda i: (0, 0)),             # W1y^T (VMEM-resident)
            pl.BlockSpec((H, 1), lambda i: (0, 0)),              # b1
            pl.BlockSpec((H, 1), lambda i: (0, 0)),              # w2
            pl.BlockSpec(memory_space=pltpu.MemorySpace.SMEM),   # b2 scalar
        ],
        out_specs=pl.BlockSpec((4, tile_b), lambda i: (0, i)),
        compiler_params=pltpu.CompilerParams(
            dimension_semantics=("parallel",),       # megacore-shardable (v7x)
            vmem_limit_bytes=vmem_limit,
        ),
    )(x_in, y_in, ys_in, w_rows, w1x_t, w1y_t, b1c, w2c, b2c)

    # --- unpack the lane-dense slab over the exact unpadded slices ---------------
    t = slab[0, :B][:, None]
    t_shuf = slab[1, :B][:, None]
    wt = slab[2, :B][:, None]
    wt_shuf = slab[3, :B][:, None]

    first_term = jnp.mean(wt)
    exp_mean = jnp.mean(jnp.exp(wt_shuf))

    new_running_mean = alpha * exp_mean + (1.0 - alpha) * running_mean
    second_term = jnp.log(new_running_mean + EPS)
    mi_estimate = first_term   # matches the PyTorch module: mi_estimate = first_term

    # Matches the PyTorch return tuple (detach() is a no-op here).
    return (
        (mi_estimate, t, w, t_shuf, wt, wt_shuf, first_term, second_term),
        new_running_mean,
    )


def _init_params(key, dx, dy, hidden):
    k1, k2, k3 = jax.random.split(key, 3)
    scale1 = 1.0 / jnp.sqrt(dx + dy)
    scale2 = 1.0 / jnp.sqrt(hidden)
    return {
        "w1x": jax.random.normal(k1, (dx, hidden), jnp.float32) * scale1,
        "w1y": jax.random.normal(k2, (dy, hidden), jnp.float32) * scale1,
        "b1": jnp.zeros((1, hidden), jnp.float32),
        "w2": jax.random.normal(k3, (hidden, 1), jnp.float32) * scale2,
        "b2": jnp.zeros((1, 1), jnp.float32),
    }


if __name__ == "__main__":
    B, DX, DY, H = 8, 32, 32, 64

    root = jax.random.PRNGKey(0)
    kp, kx, ky, kw, kperm = jax.random.split(root, 5)

    params = _init_params(kp, DX, DY, H)
    x = jax.random.normal(kx, (B, DX), jnp.float32)
    y = jax.random.normal(ky, (B, DY), jnp.float32)
    w = jax.random.uniform(kw, (B, 1), jnp.float32, 0.5, 1.5)   # positive sample weights
    running_mean = jnp.float32(0.0)                             # registered buffer init
    perm = jax.random.permutation(kperm, B)                     # torch.randperm analogue
    # TODO(synk): torch.randperm uses host RNG each forward; here the permutation is
    # passed in explicitly (functional equivalent).

    outputs, new_running_mean = weighted_mine_forward(
        params, x, y, w, running_mean, perm
    )
    outputs = jax.block_until_ready(outputs)
    new_running_mean = jax.block_until_ready(new_running_mean)

    # Pure-JAX f32 reference of T.
    def T_ref(xx, yy):
        xy = jnp.concatenate([xx, yy], axis=-1)
        w1 = jnp.concatenate([params["w1x"], params["w1y"]], axis=0)
        h = jnp.maximum(jnp.dot(xy, w1) + params["b1"], 0.0)
        return jnp.dot(h, params["w2"]) + params["b2"]

    mi, t_out, w_out, ts_out, wt_out, wts_out, ft, st = outputs
    t_ref = T_ref(x, y)
    ts_ref = T_ref(x, y[perm])

    assert jnp.allclose(t_out, t_ref, atol=2e-3), "t mismatch"
    assert jnp.allclose(ts_out, ts_ref, atol=2e-3), "t_shuffled mismatch"
    assert jnp.allclose(wt_out, w * t_out, atol=1e-5), "wt mismatch"
    assert jnp.allclose(wts_out, w[perm] * ts_out, atol=1e-5), "wt_shuffled mismatch"
    assert jnp.allclose(ft, jnp.mean(w * t_ref), atol=2e-3), "first_term mismatch"
    assert jnp.allclose(mi, ft), "mi_estimate should equal first_term"
    assert jnp.isfinite(new_running_mean), "running_mean not finite"

    print("KERNEL_OK")
</pallas_src>

<mosaic_0001>
module attributes {stable_mosaic.version = 11 : i64} {
  func.func @_weighted_mine_kernel(%arg0: i32, %arg1: memref<128x32xf32, #tpu.memory_space<vmem>>, %arg2: memref<128x32xf32, #tpu.memory_space<vmem>>, %arg3: memref<128x32xf32, #tpu.memory_space<vmem>>, %arg4: memref<2x128xf32, #tpu.memory_space<vmem>>, %arg5: memref<64x32xf32, #tpu.memory_space<vmem>>, %arg6: memref<64x32xf32, #tpu.memory_space<vmem>>, %arg7: memref<64x1xf32, #tpu.memory_space<vmem>>, %arg8: memref<64x1xf32, #tpu.memory_space<vmem>>, %arg9: memref<1xf32, #tpu.memory_space<smem>>, %arg10: memref<4x128xf32, #tpu.memory_space<vmem>>) attributes {dimension_semantics = [#tpu.dimension_semantics<parallel>], iteration_bounds = array<i64: 1>, scalar_prefetch = 0 : i64, scratch_operands = 0 : i64, tpu.core_type = #tpu.core_type<tc>, window_params = [{transform_indices = @transform_0, window_bounds = array<i64: 128, 32>}, {transform_indices = @transform_1, window_bounds = array<i64: 128, 32>}, {transform_indices = @transform_2, window_bounds = array<i64: 128, 32>}, {transform_indices = @transform_3, window_bounds = array<i64: 2, 128>}, {pipeline_mode = #tpu.pipeline_mode<synchronous>, transform_indices = @transform_4, window_bounds = array<i64: 64, 32>}, {pipeline_mode = #tpu.pipeline_mode<synchronous>, transform_indices = @transform_5, window_bounds = array<i64: 64, 32>}, {pipeline_mode = #tpu.pipeline_mode<synchronous>, transform_indices = @transform_6, window_bounds = array<i64: 64, 1>}, {pipeline_mode = #tpu.pipeline_mode<synchronous>, transform_indices = @transform_7, window_bounds = array<i64: 64, 1>}, {transform_indices = @transform_8, window_bounds = array<i64: 1>}, {transform_indices = @transform_9, window_bounds = array<i64: 4, 128>}]} {
    %c0 = arith.constant 0 : index
    %c0_0 = arith.constant 0 : index
    %0 = vector.load %arg5[%c0, %c0_0] : memref<64x32xf32, #tpu.memory_space<vmem>>, vector<64x32xf32>
    %c0_1 = arith.constant 0 : index
    %c0_2 = arith.constant 0 : index
    %1 = vector.load %arg1[%c0_1, %c0_2] : memref<128x32xf32, #tpu.memory_space<vmem>>, vector<128x32xf32>
    %cst = arith.constant dense<0.000000e+00> : vector<64x128xf32>
    %2 = tpu.matmul %0, %1, %cst {dimension_numbers = #tpu.dot_dimension_numbers<[1], [1], [0], [0], [0, 0, 1, 0], [], []>} : vector<64x32xf32>, vector<128x32xf32>, vector<64x128xf32> -> vector<64x128xf32>
    %c0_3 = arith.constant 0 : index
    %c0_4 = arith.constant 0 : index
    %3 = vector.load %arg6[%c0_3, %c0_4] : memref<64x32xf32, #tpu.memory_space<vmem>>, vector<64x32xf32>
    %c0_5 = arith.constant 0 : index
    %c0_6 = arith.constant 0 : index
    %4 = vector.load %arg2[%c0_5, %c0_6] : memref<128x32xf32, #tpu.memory_space<vmem>>, vector<128x32xf32>
    %cst_7 = arith.constant dense<0.000000e+00> : vector<64x128xf32>
    %5 = tpu.matmul %3, %4, %cst_7 {dimension_numbers = #tpu.dot_dimension_numbers<[1], [1], [0], [0], [0, 0, 1, 0], [], []>} : vector<64x32xf32>, vector<128x32xf32>, vector<64x128xf32> -> vector<64x128xf32>
    %c0_8 = arith.constant 0 : index
    %c0_9 = arith.constant 0 : index
    %6 = vector.load %arg6[%c0_8, %c0_9] : memref<64x32xf32, #tpu.memory_space<vmem>>, vector<64x32xf32>
    %c0_10 = arith.constant 0 : index
    %c0_11 = arith.constant 0 : index
    %7 = vector.load %arg3[%c0_10, %c0_11] : memref<128x32xf32, #tpu.memory_space<vmem>>, vector<128x32xf32>
    %cst_12 = arith.constant dense<0.000000e+00> : vector<64x128xf32>
    %8 = tpu.matmul %6, %7, %cst_12 {dimension_numbers = #tpu.dot_dimension_numbers<[1], [1], [0], [0], [0, 0, 1, 0], [], []>} : vector<64x32xf32>, vector<128x32xf32>, vector<64x128xf32> -> vector<64x128xf32>
    %c0_13 = arith.constant 0 : index
    %c0_14 = arith.constant 0 : index
    %9 = vector.load %arg7[%c0_13, %c0_14] : memref<64x1xf32, #tpu.memory_space<vmem>>, vector<64x1xf32>
    %c0_15 = arith.constant 0 : index
    %c0_16 = arith.constant 0 : index
    %10 = vector.load %arg8[%c0_15, %c0_16] : memref<64x1xf32, #tpu.memory_space<vmem>>, vector<64x1xf32>
    %c0_17 = arith.constant 0 : index
    %11 = memref.load %arg9[%c0_17] : memref<1xf32, #tpu.memory_space<smem>>
    %12 = arith.addf %2, %5 : vector<64x128xf32>
    %13 = vector.broadcast %9 : vector<64x1xf32> to vector<64x128xf32>
    %14 = arith.addf %12, %13 : vector<64x128xf32>
    %cst_18 = arith.constant 0.000000e+00 : f32
    %15 = vector.broadcast %cst_18 : f32 to vector<64x128xf32>
    %16 = arith.maximumf %14, %15 : vector<64x128xf32>
    %17 = arith.addf %2, %8 : vector<64x128xf32>
    %18 = vector.broadcast %9 : vector<64x1xf32> to vector<64x128xf32>
    %19 = arith.addf %17, %18 : vector<64x128xf32>
    %cst_19 = arith.constant 0.000000e+00 : f32
    %20 = vector.broadcast %cst_19 : f32 to vector<64x128xf32>
    %21 = arith.maximumf %19, %20 : vector<64x128xf32>
    %22 = vector.broadcast %10 : vector<64x1xf32> to vector<64x128xf32>
    %23 = arith.mulf %16, %22 : vector<64x128xf32>
    %cst_20 = arith.constant dense<0.000000e+00> : vector<128xf32>
    %24 = vector.multi_reduction <add>, %23, %cst_20 [0] : vector<64x128xf32> to vector<128xf32>
    %25 = vector.shape_cast %24 : vector<128xf32> to vector<1x128xf32>
    %26 = vector.broadcast %11 : f32 to vector<1x128xf32>
    %27 = arith.addf %25, %26 : vector<1x128xf32>
    %28 = vector.broadcast %10 : vector<64x1xf32> to vector<64x128xf32>
    %29 = arith.mulf %21, %28 : vector<64x128xf32>
    %cst_21 = arith.constant dense<0.000000e+00> : vector<128xf32>
    %30 = vector.multi_reduction <add>, %29, %cst_21 [0] : vector<64x128xf32> to vector<128xf32>
    %31 = vector.shape_cast %30 : vector<128xf32> to vector<1x128xf32>
    %32 = vector.broadcast %11 : f32 to vector<1x128xf32>
    %33 = arith.addf %31, %32 : vector<1x128xf32>
    %c0_22 = arith.constant 0 : index
    %c0_23 = arith.constant 0 : index
    %34 = vector.load %arg4[%c0_22, %c0_23] : memref<2x128xf32, #tpu.memory_space<vmem>>, vector<1x128xf32>
    %35 = arith.mulf %34, %27 : vector<1x128xf32>
    %c1 = arith.constant 1 : index
    %c0_24 = arith.constant 0 : index
    %36 = vector.load %arg4[%c1, %c0_24] : memref<2x128xf32, #tpu.memory_space<vmem>>, vector<1x128xf32>
    %37 = arith.mulf %36, %33 : vector<1x128xf32>
    %38 = tpu.concatenate %27, %33, %35, %37 in 0 : vector<1x128xf32>, vector<1x128xf32>, vector<1x128xf32>, vector<1x128xf32> -> vector<4x128xf32>
    %c0_25 = arith.constant 0 : index
    %c0_26 = arith.constant 0 : index
    %39 = vector.load %arg10[%c0_25, %c0_26] : memref<4x128xf32, #tpu.memory_space<vmem>>, vector<4x128xf32>
    tpu.vector_store %arg10[%c0_25, %c0_26], %38 {strides = array<i32>} : memref<4x128xf32, #tpu.memory_space<vmem>>, vector<4x128xf32>,
    return
  }
  func.func @transform_0(%arg0: i32) -> (i32, i32) {
    %c0_i32 = arith.constant 0 : i32
    %c0_i32_0 = arith.constant 0 : i32
    return %arg0, %c0_i32 : i32, i32
  }
  func.func @transform_1(%arg0: i32) -> (i32, i32) {
    %c0_i32 = arith.constant 0 : i32
    %c0_i32_0 = arith.constant 0 : i32
    return %arg0, %c0_i32 : i32, i32
  }
  func.func @transform_2(%arg0: i32) -> (i32, i32) {
    %c0_i32 = arith.constant 0 : i32
    %c0_i32_0 = arith.constant 0 : i32
    return %arg0, %c0_i32 : i32, i32
  }
  func.func @transform_3(%arg0: i32) -> (i32, i32) {
    %c0_i32 = arith.constant 0 : i32
    %c0_i32_0 = arith.constant 0 : i32
    return %c0_i32, %arg0 : i32, i32
  }
  func.func @transform_4(%arg0: i32) -> (i32, i32) {
    %c0_i32 = arith.constant 0 : i32
    %c0_i32_0 = arith.constant 0 : i32
    %c0_i32_1 = arith.constant 0 : i32
    return %c0_i32, %c0_i32_0 : i32, i32
  }
  func.func @transform_5(%arg0: i32) -> (i32, i32) {
    %c0_i32 = arith.constant 0 : i32
    %c0_i32_0 = arith.constant 0 : i32
    %c0_i32_1 = arith.constant 0 : i32
    return %c0_i32, %c0_i32_0 : i32, i32
  }
  func.func @transform_6(%arg0: i32) -> (i32, i32) {
    %c0_i32 = arith.constant 0 : i32
    %c0_i32_0 = arith.constant 0 : i32
    %c0_i32_1 = arith.constant 0 : i32
    return %c0_i32, %c0_i32_0 : i32, i32
  }
  func.func @transform_7(%arg0: i32) -> (i32, i32) {
    %c0_i32 = arith.constant 0 : i32
    %c0_i32_0 = arith.constant 0 : i32
    %c0_i32_1 = arith.constant 0 : i32
    return %c0_i32, %c0_i32_0 : i32, i32
  }
  func.func @transform_8(%arg0: i32) -> i32 {
    %c0_i32 = arith.constant 0 : i32
    %c0_i32_0 = arith.constant 0 : i32
    return %c0_i32 : i32
  }
  func.func @transform_9(%arg0: i32) -> (i32, i32) {
    %c0_i32 = arith.constant 0 : i32
    %c0_i32_0 = arith.constant 0 : i32
    return %c0_i32, %arg0 : i32, i32
  }
}

</mosaic_0001>

<bundles_post_ra>
// kernel: tpu_custom_call.1
= control target key start
LH: loop header
LB: loop body
LE: loop exit
PB: predicated region body
PF: predicated region fallthrough
CT: control target
= control target key end

     0   :  { %vm58_vm0 = vcmask 261120   ;;  %v1291_v18 = vmov 0   ;;  %s1850_s0 = inlined_call_operand.vmem [shape: f32[128,32], index: 0, kind: input, shape index: {}]   ;;  %s1851_s1 = inlined_call_operand.vmem [shape: f32[128,32], index: 1, kind: input, shape index: {}]   ;;  %s1852_s2 = inlined_call_operand.vmem [shape: f32[128,32], index: 2, kind: input, shape index: {}]   ;;  %s1853_s3 = inlined_call_operand.vmem [shape: f32[2,128], index: 3, kind: input, shape index: {}]   ;;  %s1854_s4 = inlined_call_operand.vmem [shape: f32[64,32], index: 4, kind: input, shape index: {}]   ;;  %s1855_s5 = inlined_call_operand.vmem [shape: f32[64,32], index: 5, kind: input, shape index: {}]   ;;  %s1856_s6 = inlined_call_operand.vmem [shape: f32[64,1], index: 6, kind: input, shape index: {}]   ;;  %s1857_s7 = inlined_call_operand.vmem [shape: f32[64,1], index: 7, kind: input, shape index: {}]   ;;  %s1858_s8 = inlined_call_operand.<no memory space> [shape: f32[1], index: 8, kind: input, shape index: {}]   ;;  %s1859_s9 = inlined_call_operand.hbm [shape: f32[4,128], index: 9, kind: output, shape index: {}]  }
   0x1   :  { %v42_v0 = vld [vmem:[%s1850_s0] sm:$0xff]  ;;  %v43_v1 = vld [vmem:[%s1850_s0 + $0x8] sm:$0xff]  ;;  %vm1354_vm1 = vmpackc.low %vm58_vm0, %vm58_vm0  ;;  %1265 = vset.pattern.permute.xlu0 %v1291_v18  ;;  %1266 = vset.pattern.permute.xlu1 %v1291_v18 }
   0x2   :  { %v244_v2 = vld [vmem:[%s1851_s1] sm:$0xff]  ;;  %v1103_v3 = vpack.c.bf16 %v43_v1, %v42_v0  ;;  %v245_v5 = vld [vmem:[%s1851_s1 + $0x8] sm:$0xff]  ;;  %v44_v6 = vld [vmem:[%s1850_s0 + $0x10] sm:$0xff] }
   0x3   :  { %v1151_v7 = vpack.c.bf16 %v245_v5, %v244_v2  ;;  %v45_v8 = vld [vmem:[%s1850_s0 + $0x18] sm:$0xff]  ;;  %v246_v9 = vld [vmem:[%s1851_s1 + $0x10] sm:$0xff]  ;;  %v46_v13 = vld [vmem:[%s1850_s0 + $0x20] sm:$0xff] }
   0x4   :  { %v247_v10 = vld [vmem:[%s1851_s1 + $0x18] sm:$0xff]  ;;  %1105 = vmatprep.subr.msk.bf16.mxu0 %vm1354_vm1, %v1103_v3  ;;  %v1109_v11 = vpack.c.bf16 %v45_v8, %v44_v6  ;;  %v47_v14 = vld [vmem:[%s1850_s0 + $0x28] sm:$0xff]  ;;  %v248_v15 = vld [vmem:[%s1851_s1 + $0x20] sm:$0xff] }
   0x5   :  { %v1157_v12 = vpack.c.bf16 %v247_v10, %v246_v9  ;;  %1153 = vmatprep.subr.msk.bf16.mxu1 %vm1354_vm1, %v1151_v7  ;;  %1108 = vmatpush3.bf16.xpose.msk.msra.mxu0 %vm1354_vm1, %v1103_v3  ;;  %v249_v16 = vld [vmem:[%s1851_s1 + $0x28] sm:$0xff]  ;;  %v1115_v17 = vpack.c.bf16 %v47_v14, %v46_v13  ;;  %v34_v20 = vld [vmem:[%s1854_s4] sm:$0xff]  ;;  %v48_v22 = vld [vmem:[%s1850_s0 + $0x30] sm:$0xff] }
   0x6   :  { %1156 = vmatpush3.bf16.xpose.msk.msra.mxu1 %vm1354_vm1, %v1151_v7  ;;  %1111 = vmatprep.subr.msk.bf16.mxu0 %vm1354_vm1, %v1109_v11  ;;  %v1163_v19 = vpack.c.bf16 %v249_v16, %v248_v15  ;;  %v1403_v21 = vld [vmem:[%s1855_s5] sm:$0xff]  ;;  %v49_v23 = vld [vmem:[%s1850_s0 + $0x38] sm:$0xff]  ;;  %v250_v24 = vld [vmem:[%s1851_s1 + $0x30] sm:$0xff] }
   0x7   :  { %1159 = vmatprep.subr.msk.bf16.mxu1 %vm1354_vm1, %v1157_v12  ;;  %1003 = vmatprep.mubr.msk.f32.mxu0 %vm58_vm0, %v34_v20  ;;  %v251_v25 = vld [vmem:[%s1851_s1 + $0x38] sm:$0xff]  ;;  %v1121_v26 = vpack.c.bf16 %v49_v23, %v48_v22  ;;  %v606_v28 = vld [vmem:[%s1856_s6] sm:$0xff]  ;;  %v51_v30 = vld [vmem:[%s1850_s0 + $0x48] sm:$0xff] }
   0x8   :  { %1047 = vmatprep.mubr.msk.f32.mxu1 %vm58_vm0, %v1403_v21  ;;  %v1169_v27 = vpack.c.bf16 %v251_v25, %v250_v24  ;;  %v50_v29 = vld [vmem:[%s1850_s0 + $0x40] sm:$0xff]  ;;  %633 = vperm.xlu0 %1265, %v606_v28   ;;  %v608_v31 = vld [vmem:[%s1856_s6 + $0x10] sm:$0xff]  ;;  %v253_v33 = vld [vmem:[%s1851_s1 + $0x48] sm:$0xff] }
   0x9   :  { %v252_v32 = vld [vmem:[%s1851_s1 + $0x40] sm:$0xff]  ;;  %643 = vperm.xlu1 %1266, %v608_v31   ;;  %v607_v34 = vld [vmem:[%s1856_s6 + $0x8] sm:$0xff]  ;;  %v609_v35 = vld [vmem:[%s1856_s6 + $0x18] sm:$0xff]  ;;  %v1127_v36 = vpack.c.bf16 %v51_v30, %v50_v29 }
   0xa   :  { %v1175_v37 = vpack.c.bf16 %v253_v33, %v252_v32  ;;  %v614_v38 = vld [vmem:[%s1857_s7] sm:$0xff] }
   0xc   :  { %638 = vperm.xlu0 %1265, %v607_v34  }
   0xd   :  { %1114 = vmatpush3.bf16.xpose.msk.msra.mxu0 %vm1354_vm1, %v1109_v11  ;;  %648 = vperm.xlu1 %1266, %v609_v35  }
   0xe   :  { %1162 = vmatpush3.bf16.xpose.msk.msra.mxu1 %vm1354_vm1, %v1157_v12  ;;  %1117 = vmatprep.subr.msk.bf16.mxu0 %vm1354_vm1, %v1115_v17 }
   0xf   :  { %1165 = vmatprep.subr.msk.bf16.mxu1 %vm1354_vm1, %v1163_v19 }
  0x15   :  { %1120 = vmatpush3.bf16.xpose.msk.msra.mxu0 %vm1354_vm1, %v1115_v17 }
  0x16   :  { %1168 = vmatpush3.bf16.xpose.msk.msra.mxu1 %vm1354_vm1, %v1163_v19  ;;  %1123 = vmatprep.subr.msk.bf16.mxu0 %vm1354_vm1, %v1121_v26 }
  0x17   :  { %1171 = vmatprep.subr.msk.bf16.mxu1 %vm1354_vm1, %v1169_v27 }
  0x18   :  { %15 = vsyncpa [#allocation4], 0  ;;  %v615_v39 = vld [vmem:[%s1857_s7 + $0x8] sm:$0xff]  ;;  %v52_v40 = vld [vmem:[%s1850_s0 + $0x50] sm:$0xff]  ;;  %713 = vperm.xlu0 %1265, %v614_v38   ;;  %vm806_vm2 = vcmask 1040384   ;;  %vm808_vm3 = vcmask 1041408  }
  0x19   :  { %v53_v41 = vld [vmem:[%s1850_s0 + $0x58] sm:$0xff]  ;;  %v254_v42 = vld [vmem:[%s1851_s1 + $0x50] sm:$0xff]  ;;  %718 = vperm.xlu1 %1266, %v615_v39   ;;  %v610_v44 = vld [vmem:[%s1856_s6 + $0x20] sm:$0xff]  ;;  %vm810_vm4 = vcmask 1042432  }
  0x1a   :  { %v255_v43 = vld [vmem:[%s1851_s1 + $0x58] sm:$0xff]  ;;  %v616_v45 = vld [vmem:[%s1857_s7 + $0x10] sm:$0xff]  ;;  %v1133_v46 = vpack.c.bf16 %v53_v41, %v52_v40  ;;  %v611_v48 = vld [vmem:[%s1856_s6 + $0x28] sm:$0xff] }
  0x1b   :  { %v1181_v47 = vpack.c.bf16 %v255_v43, %v254_v42  ;;  %v617_v49 = vld [vmem:[%s1857_s7 + $0x18] sm:$0xff]  ;;  %v54_v50 = vld [vmem:[%s1850_s0 + $0x60] sm:$0xff]  ;;  %v55_v51 = vld [vmem:[%s1850_s0 + $0x68] sm:$0xff] }
  0x1c   :  { %653 = vperm.xlu0 %1265, %v610_v44   ;;  %v256_v52 = vld [vmem:[%s1851_s1 + $0x60] sm:$0xff]  ;;  %v257_v53 = vld [vmem:[%s1851_s1 + $0x68] sm:$0xff]  ;;  %v612_v54 = vld [vmem:[%s1856_s6 + $0x30] sm:$0xff]  ;;  %v1139_v56 = vpack.c.bf16 %v55_v51, %v54_v50 }
  0x1d   :  { %1126 = vmatpush3.bf16.xpose.msk.msra.mxu0 %vm1354_vm1, %v1121_v26  ;;  %723 = vperm.xlu1 %1266, %v616_v45   ;;  %v618_v55 = vld [vmem:[%s1857_s7 + $0x20] sm:$0xff]  ;;  %v1187_v57 = vpack.c.bf16 %v257_v53, %v256_v52  ;;  %v613_v58 = vld [vmem:[%s1856_s6 + $0x38] sm:$0xff]  ;;  %v619_v59 = vld [vmem:[%s1857_s7 + $0x28] sm:$0xff] }
  0x1e   :  { %1174 = vmatpush3.bf16.xpose.msk.msra.mxu1 %vm1354_vm1, %v1169_v27  ;;  %1129 = vmatprep.subr.msk.bf16.mxu0 %vm1354_vm1, %v1127_v36  ;;  %v56_v60 = vld [vmem:[%s1850_s0 + $0x70] sm:$0xff]  ;;  %v57_v61 = vld [vmem:[%s1850_s0 + $0x78] sm:$0xff]  ;;  %v437_v5 = vld [vmem:[%s1852_s2] sm:$0xff] }
  0x1f   :  { %1177 = vmatprep.subr.msk.bf16.mxu1 %vm1354_vm1, %v1175_v37  ;;  %v258_v62 = vld [vmem:[%s1851_s1 + $0x70] sm:$0xff]  ;;  %v259_v63 = vld [vmem:[%s1851_s1 + $0x78] sm:$0xff]  ;;  %v1145_v2 = vpack.c.bf16 %v57_v61, %v56_v60  ;;  %v438_v6 = vld [vmem:[%s1852_s2 + $0x8] sm:$0xff] }
  0x20   :  { %658 = vperm.xlu0 %1265, %v611_v48   ;;  %v620_v0 = vld [vmem:[%s1857_s7 + $0x30] sm:$0xff]  ;;  %v621_v1 = vld [vmem:[%s1857_s7 + $0x38] sm:$0xff]  ;;  %v1193_v3 = vpack.c.bf16 %v259_v63, %v258_v62  ;;  %v1199_v7 = vpack.c.bf16 %v438_v6, %v437_v5  ;;  %v35_v10 = vld [vmem:[%s1854_s4 + $0x8] sm:$0xff] }
  0x21   :  { %728 = vperm.xlu1 %1266, %v617_v49   ;;  %v439_v8 = vld [vmem:[%s1852_s2 + $0x10] sm:$0xff]  ;;  %v440_v9 = vld [vmem:[%s1852_s2 + $0x18] sm:$0xff]  ;;  %v1590_v11 = vld [vmem:[%s1855_s5 + $0x8] sm:$0xff] }
  0x22   :  { %v36_v12 = vld [vmem:[%s1854_s4 + $0x10] sm:$0xff]  ;;  %v1205_v13 = vpack.c.bf16 %v440_v9, %v439_v8  ;;  %v37_v15 = vld [vmem:[%s1854_s4 + $0x18] sm:$0xff]  ;;  %v38_v17 = vld [vmem:[%s1854_s4 + $0x20] sm:$0xff] }
  0x23   :  { %v1599_v14 = vld [vmem:[%s1855_s5 + $0x10] sm:$0xff]  ;;  %v1614_v16 = vld [vmem:[%s1855_s5 + $0x18] sm:$0xff]  ;;  %v240_v18 = vld [vmem:[%s1855_s5 + $0x20] sm:$0xff] }
  0x24   :  { %663 = vperm.xlu0 %1265, %v612_v54   ;;  %v441_v19 = vld [vmem:[%s1852_s2 + $0x20] sm:$0xff]  ;;  %v442_v20 = vld [vmem:[%s1852_s2 + $0x28] sm:$0xff]  ;;  %v40_v24 = vld [vmem:[%s1854_s4 + $0x30] sm:$0xff] }
  0x25   :  { %1132 = vmatpush3.bf16.xpose.msk.msra.mxu0 %vm1354_vm1, %v1127_v36  ;;  %733 = vperm.xlu1 %1266, %v618_v55   ;;  %v39_v22 = vld [vmem:[%s1854_s4 + $0x28] sm:$0xff]  ;;  %v1211_v25 = vpack.c.bf16 %v442_v20, %v441_v19  ;;  %v242_v26 = vld [vmem:[%s1855_s5 + $0x30] sm:$0xff]  ;;  %v41_v27 = vld [vmem:[%s1854_s4 + $0x38] sm:$0xff] }
  0x26   :  { %1180 = vmatpush3.bf16.xpose.msk.msra.mxu1 %vm1354_vm1, %v1175_v37  ;;  %1135 = vmatprep.subr.msk.bf16.mxu0 %vm1354_vm1, %v1133_v46  ;;  %v241_v23 = vld [vmem:[%s1855_s5 + $0x28] sm:$0xff]  ;;  %v243_v28 = vld [vmem:[%s1855_s5 + $0x38] sm:$0xff]  ;;  %v443_v29 = vld [vmem:[%s1852_s2 + $0x30] sm:$0xff] }
  0x27   :  { %1183 = vmatprep.subr.msk.bf16.mxu1 %vm1354_vm1, %v1181_v47  ;;  %v444_v30 = vld [vmem:[%s1852_s2 + $0x38] sm:$0xff]  ;;  %v445_v32 = vld [vmem:[%s1852_s2 + $0x40] sm:$0xff]  ;;  %v447_v34 = vld [vmem:[%s1852_s2 + $0x50] sm:$0xff] }
  0x28   :  { %668 = vperm.xlu0 %1265, %v613_v58   ;;  %v1217_v31 = vpack.c.bf16 %v444_v30, %v443_v29  ;;  %v448_v35 = vld [vmem:[%s1852_s2 + $0x58] sm:$0xff]  ;;  %v449_v37 = vld [vmem:[%s1852_s2 + $0x60] sm:$0xff]  ;;  %v450_v38 = vld [vmem:[%s1852_s2 + $0x68] sm:$0xff] }
  0x29   :  { %738 = vperm.xlu1 %1266, %v619_v59   ;;  %v1229_v36 = vpack.c.bf16 %v448_v35, %v447_v34  ;;  %v1235_v39 = vpack.c.bf16 %v450_v38, %v449_v37  ;;  %v451_v40 = vld [vmem:[%s1852_s2 + $0x70] sm:$0xff]  ;;  %v452_v41 = vld [vmem:[%s1852_s2 + $0x78] sm:$0xff] }
  0x2a   :  { %v1241_v42 = vpack.c.bf16 %v452_v41, %v451_v40 }
  0x2c   :  { %743 = vperm.xlu0 %1265, %v620_v0  }
  0x2d   :  { %1138 = vmatpush3.bf16.xpose.msk.msra.mxu0 %vm1354_vm1, %v1133_v46  ;;  %748 = vperm.xlu1 %1266, %v621_v1  }
  0x2e   :  { %1186 = vmatpush3.bf16.xpose.msk.msra.mxu1 %vm1354_vm1, %v1181_v47  ;;  %1141 = vmatprep.subr.msk.bf16.mxu0 %vm1354_vm1, %v1139_v56 }
  0x2f   :  { %1189 = vmatprep.subr.msk.bf16.mxu1 %vm1354_vm1, %v1187_v57 }
  0x35   :  { %1144 = vmatpush3.bf16.xpose.msk.msra.mxu0 %vm1354_vm1, %v1139_v56 }
  0x36   :  { %1192 = vmatpush3.bf16.xpose.msk.msra.mxu1 %vm1354_vm1, %v1187_v57  ;;  %1147 = vmatprep.subr.msk.bf16.mxu0 %vm1354_vm1, %v1145_v2 }
  0x37   :  { %1195 = vmatprep.subr.msk.bf16.mxu1 %vm1354_vm1, %v1193_v3 }
  0x3d   :  { %1150 = vmatpush3.bf16.xpose.msk.msra.mxu0 %vm1354_vm1, %v1145_v2 }
  0x3e   :  { %1198 = vmatpush3.bf16.xpose.msk.msra.mxu1 %vm1354_vm1, %v1193_v3  ;;  %1201 = vmatprep.subr.msk.bf16.mxu0 %vm1354_vm1, %v1199_v7 }
  0x3f   :  { %1247 = vmatprep.subr.msk.bf16.mxu1 %vm1354_vm1, %v1199_v7 }
  0x44   :  { %1004 = vmatmul.mubr.msk.f32.vlgmr.msra.gmra.mrb[0].mxu0 %vm58_vm0, %v35_v10 }
  0x45   :  { %1048 = vmatmul.mubr.msk.f32.vlgmr.msra.gmra.mrb[0].mxu1 %vm58_vm0, %v1590_v11  ;;  %1204 = vmatpush3.bf16.xpose.msk.msra.mxu0 %vm1354_vm1, %v1199_v7 }
  0x46   :  { %1255 = vmatpush3.bf16.xpose.msk.msra.mxu1 %vm1354_vm1, %v1199_v7  ;;  %1006 = vmatprep.mubr.msk.f32.mxu0 %vm58_vm0, %v36_v12 }
  0x47   :  { %1050 = vmatprep.mubr.msk.f32.mxu1 %vm58_vm0, %v1599_v14  ;;  %1207 = vmatprep.subr.msk.bf16.mxu0 %vm1354_vm1, %v1205_v13 }
  0x48   :  { %1007 = vmatmul.mubr.msk.f32.gmra.mrb[2].mxu0 %vm58_vm0, %v37_v15  ;;  %1248 = vmatprep.subr.msk.bf16.mxu1 %vm1354_vm1, %v1205_v13 }
  0x49   :  { %1051 = vmatmul.mubr.msk.f32.gmra.mrb[2].mxu1 %vm58_vm0, %v1614_v16  ;;  %1009 = vmatprep.mubr.msk.f32.mxu0 %vm58_vm0, %v38_v17 }
  0x4a   :  { %1053 = vmatprep.mubr.msk.f32.mxu1 %vm58_vm0, %v240_v18 }
  0x4c   :  { %1010 = vmatmul.mubr.msk.f32.gmra.mrb[4].mxu0 %vm58_vm0, %v39_v22 }
  0x4d   :  { %1054 = vmatmul.mubr.msk.f32.gmra.mrb[4].mxu1 %vm58_vm0, %v241_v23  ;;  %1210 = vmatpush3.bf16.xpose.msk.msra.mxu0 %vm1354_vm1, %v1205_v13 }
  0x4e   :  { %1256 = vmatpush3.bf16.xpose.msk.msra.mxu1 %vm1354_vm1, %v1205_v13  ;;  %1012 = vmatprep.mubr.msk.f32.mxu0 %vm58_vm0, %v40_v24 }
  0x4f   :  { %1056 = vmatprep.mubr.msk.f32.mxu1 %vm58_vm0, %v242_v26  ;;  %1213 = vmatprep.subr.msk.bf16.mxu0 %vm1354_vm1, %v1211_v25 }
  0x50   :  { %1013 = vmatmul.mubr.msk.f32.gmra.mrb[6].mxu0 %vm58_vm0, %v41_v27  ;;  %1249 = vmatprep.subr.msk.bf16.mxu1 %vm1354_vm1, %v1211_v25 }
  0x51   :  { %1057 = vmatmul.mubr.msk.f32.gmra.mrb[6].mxu1 %vm58_vm0, %v243_v28  ;;  %1091 = vmatprep.mubr.msk.f32.mxu0 %vm58_vm0, %v1403_v21  ;;  %v446_v21 = vld [vmem:[%s1852_s2 + $0x48] sm:$0xff] }
  0x52   :  { %1097 = vmatprep.mubr.msk.f32.mxu1 %vm58_vm0, %v240_v18  ;;  %v1223_v33 = vpack.c.bf16 %v446_v21, %v445_v32 }
  0x55   :  { %1216 = vmatpush3.bf16.xpose.msk.msra.mxu0 %vm1354_vm1, %v1211_v25 }
  0x56   :  { %1257 = vmatpush3.bf16.xpose.msk.msra.mxu1 %vm1354_vm1, %v1211_v25  ;;  %1219 = vmatprep.subr.msk.bf16.mxu0 %vm1354_vm1, %v1217_v31 }
  0x57   :  { %1250 = vmatprep.subr.msk.bf16.mxu1 %vm1354_vm1, %v1217_v31 }
  0x5d   :  { %1222 = vmatpush3.bf16.xpose.msk.msra.mxu0 %vm1354_vm1, %v1217_v31 }
  0x5e   :  { %1258 = vmatpush3.bf16.xpose.msk.msra.mxu1 %vm1354_vm1, %v1217_v31  ;;  %1225 = vmatprep.subr.msk.bf16.mxu0 %vm1354_vm1, %v1223_v33 }
  0x5f   :  { %1251 = vmatprep.subr.msk.bf16.mxu1 %vm1354_vm1, %v1223_v33 }
  0x65   :  { %1228 = vmatpush3.bf16.xpose.msk.msra.mxu0 %vm1354_vm1, %v1223_v33 }
  0x66   :  { %1259 = vmatpush3.bf16.xpose.msk.msra.mxu1 %vm1354_vm1, %v1223_v33  ;;  %1231 = vmatprep.subr.msk.bf16.mxu0 %vm1354_vm1, %v1229_v36 }
  0x67   :  { %1252 = vmatprep.subr.msk.bf16.mxu1 %vm1354_vm1, %v1229_v36 }
  0x6d   :  { %1234 = vmatpush3.bf16.xpose.msk.msra.mxu0 %vm1354_vm1, %v1229_v36 }
  0x6e   :  { %1260 = vmatpush3.bf16.xpose.msk.msra.mxu1 %vm1354_vm1, %v1229_v36  ;;  %1237 = vmatprep.subr.msk.bf16.mxu0 %vm1354_vm1, %v1235_v39 }
  0x6f   :  { %1253 = vmatprep.subr.msk.bf16.mxu1 %vm1354_vm1, %v1235_v39 }
  0x75   :  { %1240 = vmatpush3.bf16.xpose.msk.msra.mxu0 %vm1354_vm1, %v1235_v39 }
  0x76   :  { %1261 = vmatpush3.bf16.xpose.msk.msra.mxu1 %vm1354_vm1, %v1235_v39  ;;  %1243 = vmatprep.subr.msk.bf16.mxu0 %vm1354_vm1, %v1241_v42 }
  0x77   :  { %1254 = vmatprep.subr.msk.bf16.mxu1 %vm1354_vm1, %v1241_v42 }
  0x7d   :  { %1246 = vmatpush3.bf16.xpose.msk.msra.mxu0 %vm1354_vm1, %v1241_v42 }
  0x7e   :  { %1262 = vmatpush3.bf16.xpose.msk.msra.mxu1 %vm1354_vm1, %v1241_v42 }
  0x84   :  { %1092 = vmatmul.mubr.msk.f32.vlgmr.msra.gmra.mrb[8].mxu0 %vm58_vm0, %v1590_v11 }
  0x85   :  { %1098 = vmatmul.mubr.msk.f32.vlgmr.msra.gmra.mrb[8].mxu1 %vm58_vm0, %v241_v23  ;;  %1094 = vmatprep.mubr.msk.f32.mxu0 %vm58_vm0, %v1599_v14 }
  0x86   :  { %1100 = vmatprep.mubr.msk.f32.mxu1 %vm58_vm0, %v242_v26 }
  0x87   :  { %v1757_v43 = vpop.permute.xlu0 %633 }
  0x88   :  { %1095 = vmatmul.mubr.msk.f32.gmra.mrb[10].mxu0 %vm58_vm0, %v1614_v16  ;;  %v1759_v44 = vpop.permute.xlu1 %643 }
  0x89   :  { %1101 = vmatmul.mubr.msk.f32.gmra.mrb[10].mxu1 %vm58_vm0, %v243_v28 }
  0x8b   :  { %v1761_v4 = vpop.permute.xlu0 %638 }
  0x8c   :  { %v1763_v45 = vpop.permute.xlu1 %648 }
  0x97   :  { %v1765_v46 = vpop.permute.xlu0 %713 }
  0x98   :  { %v1767_v47 = vpop.permute.xlu1 %718 }
  0x9b   :  { %v1769_v48 = vpop.permute.xlu0 %653 }
  0x9c   :  { %v1771_v49 = vpop.permute.xlu1 %723 }
  0x9f   :  { %v1773_v50 = vpop.permute.xlu0 %658 }
  0xa0   :  { %v1777_v52 = vpop.permute.xlu1 %728 }
  0xa3   :  { %v1786_v60 = vpop.permute.xlu0 %663 }
  0xa4   :  { %v1792_v3 = vpop.permute.xlu1 %733 }
  0xa7   :  { %v1799_v20 = vpop.permute.xlu0 %668 }
  0xa8   :  { %v1802_v24 = vpop.permute.xlu1 %738 }
  0xab   :  { %v744_v41 = vpop.permute.xlu0 %743 }
  0xac   :  { %v749_v42 = vpop.permute.xlu1 %748 }
 0x117   :  { %v1775_v51 = vpop.f32.mrb[0].mxu0 }
 0x118   :  { %v1049_v53 = vpop.f32.mrb[0].mxu1  ;;  %v1779_v54 = vpop.f32.mrb[1].mxu0 }
 0x119   :  { %v624_v55 = vadd.f32 %v1049_v53, %v1775_v51  ;;  %v398_v56 = vpop.f32.mrb[1].mxu1 }
 0x11a   :  { %v623_v57 = vadd.f32 %v398_v56, %v1779_v54 }
 0x11b   :  { %v672_v58 = vadd.f32 %v1761_v4, %v624_v55  ;;  %v1784_v59 = vpop.f32.mrb[2].mxu0 }
 0x11c   :  { %v671_v61 = vadd.f32 %v1757_v43, %v623_v57  ;;  %v1052_v62 = vpop.f32.mrb[2].mxu1  ;;  %v1789_v63 = vpop.f32.mrb[3].mxu0 }
 0x11d   :  { %v680_v0 = vmax.f32 %v672_v58, 0.0  ;;  %v626_v1 = vadd.f32 %v1052_v62, %v1784_v59  ;;  %v408_v2 = vpop.f32.mrb[3].mxu1 }
 0x11e   :  { %v679_v5 = vmax.f32 %v671_v61, 0.0  ;;  %v625_v6 = vadd.f32 %v408_v2, %v1789_v63 }
 0x11f   :  { %v752_v7 = vmul.f32 %v1767_v47, %v680_v0  ;;  %v674_v8 = vadd.f32 %v1763_v45, %v626_v1  ;;  %v1011_v9 = vpop.f32.mrb[4].mxu0 }
 0x120   :  { %v751_v10 = vmul.f32 %v1765_v46, %v679_v5  ;;  %v673_v11 = vadd.f32 %v1759_v44, %v625_v6  ;;  %v1055_v12 = vpop.f32.mrb[4].mxu1  ;;  %v217_v13 = vpop.f32.mrb[5].mxu0 }
 0x121   :  { %v682_v14 = vmax.f32 %v674_v8, 0.0  ;;  %v628_v15 = vadd.f32 %v1055_v12, %v1011_v9  ;;  %v418_v16 = vpop.f32.mrb[5].mxu1 }
 0x122   :  { %v759_v17 = vadd.f32 %v752_v7, %v751_v10  ;;  %v681_v18 = vmax.f32 %v673_v11, 0.0  ;;  %v627_v19 = vadd.f32 %v418_v16, %v217_v13 }
 0x123   :  { %v676_v22 = vadd.f32 %v1773_v50, %v628_v15  ;;  %v1014_v23 = vpop.f32.mrb[6].mxu0  ;;  %v754_v26 = vmul.f32 %v1777_v52, %v682_v14 }
 0x124   :  { %v753_v25 = vmul.f32 %v1771_v49, %v681_v18  ;;  %v675_v27 = vadd.f32 %v1769_v48, %v627_v19  ;;  %v1058_v28 = vpop.f32.mrb[6].mxu1  ;;  %v227_v29 = vpop.f32.mrb[7].mxu0 }
 0x125   :  { %v684_v30 = vmax.f32 %v676_v22, 0.0  ;;  %v630_v31 = vadd.f32 %v1058_v28, %v1014_v23  ;;  %v428_v32 = vpop.f32.mrb[7].mxu1 }
 0x126   :  { %v760_v21 = vadd.f32 %v759_v17, %v753_v25  ;;  %v683_v33 = vmax.f32 %v675_v27, 0.0  ;;  %v629_v34 = vadd.f32 %v428_v32, %v227_v29 }
 0x127   :  { %v678_v35 = vadd.f32 %v1799_v20, %v630_v31  ;;  %v756_v39 = vmul.f32 %v1802_v24, %v684_v30 }
 0x128   :  { %v761_v36 = vadd.f32 %v760_v21, %v754_v26  ;;  %v755_v37 = vmul.f32 %v1792_v3, %v683_v33  ;;  %v677_v38 = vadd.f32 %v1786_v60, %v629_v34 }
 0x129   :  { %v686_v40 = vmax.f32 %v678_v35, 0.0 }
 0x12a   :  { %v762_v53 = vadd.f32 %v761_v36, %v755_v37  ;;  %v685_v55 = vmax.f32 %v677_v38, 0.0 }
 0x12b   :  { %v758_v58 = vmul.f32 %v749_v42, %v686_v40 }
 0x12c   :  { %v763_v56 = vadd.f32 %v762_v53, %v756_v39  ;;  %v757_v57 = vmul.f32 %v744_v41, %v685_v55 }
 0x12e   :  { %v764_v61 = vadd.f32 %v763_v56, %v757_v57 }
 0x130   :  { %v765_v62 = vadd.f32 %v764_v61, %v758_v58 }
 0x157   :  { %v1093_v0 = vpop.f32.mrb[8].mxu0 }
 0x158   :  { %v688_v1 = vadd.f32 %v1093_v0, %v1775_v51  ;;  %v1099_v2 = vpop.f32.mrb[8].mxu1  ;;  %v567_v5 = vpop.f32.mrb[9].mxu0 }
 0x159   :  { %v692_v6 = vadd.f32 %v1099_v2, %v1011_v9  ;;  %v687_v7 = vadd.f32 %v567_v5, %v1779_v54  ;;  %v587_v8 = vpop.f32.mrb[9].mxu1  ;;  %v766_v9 = vrot.slane %v765_v62, 4 }
 0x15a   :  { %v696_v10 = vadd.f32 %v688_v1, %v1761_v4  ;;  %v691_v11 = vadd.f32 %v587_v8, %v217_v13 }
 0x15b   :  { %v695_v12 = vadd.f32 %v687_v7, %v1757_v43  ;;  %v1096_v14 = vpop.f32.mrb[10].mxu0  ;;  %v767_v31 = vadd.f32 %v766_v9, %v765_v62  ;;  %v798_v62 = vld [vmem:[%s1853_s3 + $0x1] sm:$0x1] }
 0x15c   :  { %v704_v15 = vmax.f32 %v696_v10, 0.0  ;;  %v690_v16 = vadd.f32 %v1096_v14, %v1784_v59  ;;  %v1102_v17 = vpop.f32.mrb[10].mxu1  ;;  %v577_v18 = vpop.f32.mrb[11].mxu0  ;;  %v699_v43 = vadd.f32 %v691_v11, %v1769_v48  ;;  %v700_v59 = vadd.f32 %v692_v6, %v1773_v50 }
 0x15d   :  { %v703_v19 = vmax.f32 %v695_v12, 0.0  ;;  %v694_v22 = vadd.f32 %v1102_v17, %v1014_v23  ;;  %v689_v51 = vadd.f32 %v577_v18, %v1789_v63  ;;  %v597_v25 = vpop.f32.mrb[11].mxu1  ;;  %v768_v48 = vrot.slane %v767_v31, 2 }
 0x15e   :  { %v775_v54 = vmul.f32 %v1767_v47, %v704_v15  ;;  %v698_v26 = vadd.f32 %v690_v16, %v1763_v45  ;;  %v693_v4 = vadd.f32 %v597_v25, %v227_v29  ;;  %v707_v63 = vmax.f32 %v699_v43, 0.0 }
 0x15f   :  { %v774_v13 = vmul.f32 %v1765_v46, %v703_v19  ;;  %v697_v27 = vadd.f32 %v689_v51, %v1759_v44  ;;  %v708_v21 = vmax.f32 %v700_v59, 0.0  ;;  %v702_v46 = vadd.f32 %v694_v22, %v1799_v20 }
 0x160   :  { %v706_v30 = vmax.f32 %v698_v26, 0.0  ;;  %v701_v47 = vadd.f32 %v693_v4, %v1786_v60  ;;  %v778_v44 = vmul.f32 %v1792_v3, %v707_v63  ;;  %v769_v37 = vadd.f32 %v768_v48, %v767_v31 }
 0x161   :  { %v782_v28 = vadd.f32 %v775_v54, %v774_v13  ;;  %v705_v23 = vmax.f32 %v697_v27, 0.0  ;;  %v779_v34 = vmul.f32 %v1802_v24, %v708_v21  ;;  %v710_v35 = vmax.f32 %v702_v46, 0.0  ;;  %v796_v24 = vld [vmem:[%s1853_s3] sm:$0x1] }
 0x162   :  { %v777_v45 = vmul.f32 %v1777_v52, %v706_v30  ;;  %v709_v50 = vmax.f32 %v701_v47, 0.0  ;;  %v770_v40 = vrot.slane %v769_v37, 1  ;;  %v772_v3 = vstv %s1858_s8  ;;  %s1292_s8 = smov [#allocation3]  }
 0x163   :  { %v776_v32 = vmul.f32 %v1771_v49, %v705_v23  ;;  %v781_v39 = vmul.f32 %v749_v42, %v710_v35  ;;  %s819_s13 = sshll.u32 %s1292_s8, 4  ;;  %s820_s13 = int_to_ptr.vmem [resolvable:$true] %s819_s13 }
 0x164   :  { %v780_v38 = vmul.f32 %v744_v41, %v709_v50  ;;  %v771_v55 = vadd.f32 %v770_v40, %v769_v37  ;;  %s1267_s14 = scalar_lea.vmem %s820_s13, 64  ;;  %p1272_p1 = scmp.lt.s32.totalorder %s820_s13, %s820_s13 }
 0x165   :  { %v783_v29 = vadd.f32 %v782_v28, %v776_v32  ;;  %p1268_p0 = scmp.ne.s32.totalorder %s820_s13, %s1267_s14  ;;  %p1273_p2 = scmp.lt.s32.totalorder %s1267_s14, %s1267_s14 }
 0x166   :  { %v773_v57 = vadd.f32 %v772_v3, %v771_v55 }
 0x167   :  { %v784_v33 = vadd.f32 %v783_v29, %v777_v45  ;;  %p1274_p3 = por %p1273_p2, %p1272_p1 }
 0x168   :  { %v797_v61 = vmul.f32 %v796_v24, %v773_v57 }
 0x169   :  { %v785_v36 = vadd.f32 %v784_v33, %v778_v44  ;;  %p1275_p4 = pnand %p1274_p3, %p1268_p0 }
 0x16a   :  { %v801_v1 = vrot.slane %v797_v61, 6 }
 0x16b   :  { %v786_v49 = vadd.f32 %v785_v36, %v779_v34 }
 0x16d   :  { %v787_v60 = vadd.f32 %v786_v49, %v780_v38 }
 0x16f   :  { %v788_v53 = vadd.f32 %v787_v60, %v781_v39 }
 0x171   :  { %v789_v52 = vrot.slane %v788_v53, 4 }
 0x173   :  { %v790_v20 = vadd.f32 %v789_v52, %v788_v53 }
 0x175   :  { %v791_v56 = vrot.slane %v790_v20, 2 }
 0x177   :  { %v792_v58 = vadd.f32 %v791_v56, %v790_v20 }
 0x179   :  { %v793_v41 = vrot.slane %v792_v58, 1 }
 0x17b   :  { %v794_v42 = vadd.f32 %v793_v41, %v792_v58 }
 0x17d   :  { %v795_v0 = vadd.f32 %v794_v42, %v772_v3 }
 0x17f   :  { %v799_v2 = vmul.f32 %v798_v62, %v795_v0  ;;  %v807_v5 = vsel %vm806_vm2, %v773_v57, %v795_v0 }
 0x180   :  { %v809_v6 = vsel %vm808_vm3, %v807_v5, %v801_v1 }
 0x181   :  { %v804_v7 = vrot.slane %v799_v2, 5 }
 0x183   :  { %v811_v8 = vsel %vm810_vm4, %v809_v6, %v804_v7 }
 0x184   :  { %812 = vst [vmem:[#allocation3] sm:$0xf] %v811_v8 }
 0x185   :  { %1278 = shalt.err (!%p1275_p4)
}
 0x186   :  { %s1279_s15 = scalar_lea.hbm %s1859_s9, 64 }
 0x187   :  { %p1280_p5 = scmp.ne.s32.totalorder %s1859_s9, %s1279_s15  ;;  %p1283_p6 = scmp.lt.u32.totalorder %s1279_s15, %s1859_s9 }
 0x189   :  { %p1285_p7 = pnand %p1283_p6, %p1280_p5 }
 0x18b   :  { %1288 = shalt.err (!%p1285_p7)
}
 0x18c   :  { %822 = dma.vmem_to_hbm [thread:$0]  %s820_s13, 64, %s1859_s9, [#allocation4]  }
 0x18d   :  { %1289 = dma.done.wait [#allocation4], 64  }
 0x18e   :  { %1290 = vsyncadd [#allocation4], 4294967232 }
 0x18f   :  { %826 = vsyncpa [#allocation4], 1 }

</bundles_post_ra>
